<compile_context>
chip_gen: v7x
topology: tpu7x:2x2x1
jax: 0.10.0
libtpu: 0.0.40
codegen_flags: <defaults>
</compile_context>

<pallas_src>
import functools
import math

import jax
import jax.numpy as jnp
import numpy as np
from jax.experimental import pallas as pl
from jax.experimental.pallas import tpu as pltpu


def _pick_row_tile(H, B, min_steps=4):
    """Largest divisor of H giving >= min_steps total grid steps, preferring
    sublane-aligned (multiple-of-8) row tiles; falls back to full height."""
    for d in range(H, 0, -1):
        if H % d == 0 and B * (H // d) >= min_steps and (d % 8 == 0 or d == H):
            return d
    return H


# ----------------------------------------------------------------------------
# Fused FEC kernel (one grid step = TH output rows of one batch image)
#   x_ref : (H+2, (W+2)*C) f32   padded image, resident per batch element
#   w1_ref: (3, (W+2)*C, W*mid) bf16  banded conv1 weight (one slab per row tap)
#   w2_ref: (W*mid, W*out) bf16  block-diag 1x1 weight, bn2 scale folded in
#   v_ref : (8, W*mid) f32       row0=s1, row1=b1*s1+h1, row2=h2+b1 (tiled by W)
#   o_ref : (TH, W*out) bf16     lane-dense output slab
# ----------------------------------------------------------------------------
def _fec_kernel(x_ref, w1_ref, w2_ref, v_ref, o_ref, *, TH):
    r = pl.program_id(1)
    row0 = r * TH
    if TH % 8 == 0:
        row0 = pl.multiple_of(row0, 8)

    # Row window covering the 3x3 halo: padded rows [row0, row0 + TH + 2).
    win = x_ref[pl.ds(row0, TH + 2), :]                      # (TH+2, K) f32

    # conv1 (pre-bias) as 3 row-shifted banded matmuls, f32 accumulation.
    c1 = jnp.dot(win[0:TH].astype(jnp.bfloat16), w1_ref[0],
                 preferred_element_type=jnp.float32)
    c1 = c1 + jnp.dot(win[1:TH + 1].astype(jnp.bfloat16), w1_ref[1],
                      preferred_element_type=jnp.float32)
    c1 = c1 + jnp.dot(win[2:TH + 2].astype(jnp.bfloat16), w1_ref[2],
                      preferred_element_type=jnp.float32)    # (TH, W*mid)

    s1 = v_ref[0:1, :]      # bn1 scale
    h1p = v_ref[1:2, :]     # b1*s1 + bn1 shift
    h2p = v_ref[2:3, :]     # bn2 shift + b1  (residual identity = c1 + b1)

    # bn1 + ReLU  (identity c1 stays in f32, never leaves VMEM/vregs)
    act = jnp.maximum(c1 * s1 + h1p, 0.0).astype(jnp.bfloat16)

    # conv2 (1x1, block-diagonal, bn2 scale pre-folded) + residual + ReLU
    y = jnp.dot(act, w2_ref[...], preferred_element_type=jnp.float32)
    o_ref[...] = jnp.maximum(y + c1 + h2p, 0.0).astype(o_ref.dtype)


# ----------------------------------------------------------------------------
def fec_forward(x, params, eps=1e-5):
    """x: (B, Cin, H, W) NCHW float32 -> (B, out_ch, H, W) float32."""
    B, C, H, W = x.shape
    mid = params['w1'].shape[0]
    out = params['w2'].shape[0]
    assert mid == out, "FEC residual add requires mid_ch == out_ch"

    # Padded NHWC input, flattened to 2D rows (row = (W+2)*C values).
    # TODO(synk): a NHWC-native surrounding model would remove this transpose.
    xh = jnp.transpose(x, (0, 2, 3, 1))                      # (B, H, W, C)
    xp = jnp.pad(xh, ((0, 0), (1, 1), (1, 1), (0, 0)))
    Kb = (W + 2) * C
    x2 = xp.reshape(B, H + 2, Kb)                            # contiguous

    # Folded eval-mode BatchNorm parameters.
    s1 = params['bn1']['weight'] / jnp.sqrt(params['bn1']['var'] + eps)
    h1 = params['bn1']['bias'] - params['bn1']['mean'] * s1
    s2 = params['bn2']['weight'] / jnp.sqrt(params['bn2']['var'] + eps)
    h2 = params['bn2']['bias'] - params['bn2']['mean'] * s2
    h1p = params['b1'] * s1 + h1          # shift for the bn1/ReLU branch
    h2p = h2 + params['b1']               # shift for the final add (ident bias)

    # Banded conv1 weight: band[ki][(w+kj)*C + c, w*mid + m] = W1[m, c, ki, kj]
    WMID = W * mid
    w1 = params['w1']                                        # (mid, C, 3, 3)
    bands = []
    for ki in range(3):
        acc = jnp.zeros((Kb, WMID), jnp.float32)
        for kj in range(3):
            sel = jnp.eye(W + 2, W, k=-kj, dtype=jnp.float32)   # sel[w+kj, w]=1
            tap = w1[:, :, ki, kj].T                             # (C, mid)
            acc = acc + jnp.kron(sel, tap)
        bands.append(acc)
    w1_band = jnp.stack(bands).astype(jnp.bfloat16)          # (3, Kb, W*mid)

    # Block-diagonal 1x1 conv weight with bn2 scale folded in.
    w2m = params['w2'].reshape(out, mid).T * s2[None, :]     # (mid, out)
    w2_bd = jnp.kron(jnp.eye(W, dtype=jnp.float32), w2m).astype(jnp.bfloat16)

    # Per-channel vectors tiled over W into the lane layout, packed in one ref.
    vecs = jnp.zeros((8, WMID), jnp.float32)
    vecs = vecs.at[0].set(jnp.tile(s1, W))
    vecs = vecs.at[1].set(jnp.tile(h1p, W))
    vecs = vecs.at[2].set(jnp.tile(h2p, W))

    TH = _pick_row_tile(H, B)             # >=4 grid steps (>=2 per v7x core)
    nrg = H // TH
    WOUT = W * out

    out4 = pl.pallas_call(
        functools.partial(_fec_kernel, TH=TH),
        out_shape=jax.ShapeDtypeStruct((B, nrg, TH, WOUT), jnp.bfloat16),
        grid=(B, nrg),
        in_specs=[
            pl.BlockSpec((None, H + 2, Kb), lambda b, r: (b, 0, 0)),   # image
            pl.BlockSpec((3, Kb, WMID), lambda b, r: (0, 0, 0)),       # conv1 band
            pl.BlockSpec((WMID, WOUT), lambda b, r: (0, 0)),           # conv2 diag
            pl.BlockSpec((8, WMID), lambda b, r: (0, 0)),              # BN vectors
        ],
        out_specs=pl.BlockSpec((None, None, TH, WOUT),
                               lambda b, r: (b, r, 0, 0)),
        compiler_params=pltpu.CompilerParams(
            dimension_semantics=("parallel", "parallel")),
    )(x2, w1_band, w2_bd, vecs)

    y = out4.reshape(B, H, W, out).astype(jnp.float32)
    return jnp.transpose(y, (0, 3, 1, 2))


# ----------------------------------------------------------------------------
# Pure-JAX f32 reference (mirrors PyTorch FEC.forward in eval mode)
# ----------------------------------------------------------------------------
def fec_reference(x, params, eps=1e-5):
    def bn(v, p):
        return ((v - p['mean'][None, :, None, None])
                / jnp.sqrt(p['var'][None, :, None, None] + eps)
                * p['weight'][None, :, None, None]
                + p['bias'][None, :, None, None])

    dn = ('NCHW', 'OIHW', 'NCHW')
    y = jax.lax.conv_general_dilated(x, params['w1'], (1, 1),
                                     ((1, 1), (1, 1)), dimension_numbers=dn)
    y = y + params['b1'][None, :, None, None]
    ident = y
    y = jnp.maximum(bn(y, params['bn1']), 0.0)
    y = jax.lax.conv_general_dilated(y, params['w2'], (1, 1), 'VALID',
                                     dimension_numbers=dn)
    y = bn(y, params['bn2'])
    return jnp.maximum(y + ident, 0.0)


# ----------------------------------------------------------------------------
# Deterministic parameter init (fresh module, eval-mode BN stats)
# ----------------------------------------------------------------------------
def init_fec_params(key, in_ch, mid_ch, out_ch):
    k1, k2, k3 = jax.random.split(key, 3)
    std1 = math.sqrt(2.0 / (mid_ch * 9))
    w1 = std1 * jax.random.normal(k1, (mid_ch, in_ch, 3, 3), jnp.float32)
    b1 = 0.01 * jax.random.normal(k2, (mid_ch,), jnp.float32)
    std2 = math.sqrt(2.0 / out_ch)
    w2 = std2 * jax.random.normal(k3, (out_ch, mid_ch, 1, 1), jnp.float32)

    def bn(c):
        return {'weight': jnp.ones((c,), jnp.float32),
                'bias': jnp.zeros((c,), jnp.float32),
                'mean': jnp.zeros((c,), jnp.float32),
                'var': jnp.ones((c,), jnp.float32)}

    return {'w1': w1, 'b1': b1, 'w2': w2, 'bn1': bn(mid_ch), 'bn2': bn(out_ch)}


# ----------------------------------------------------------------------------
if __name__ == "__main__":
    B, Cin, H, W = 2, 4, 16, 16
    mid_ch = out_ch = 32

    params = init_fec_params(jax.random.PRNGKey(0), Cin, mid_ch, out_ch)
    x = jax.random.normal(jax.random.PRNGKey(0), (B, Cin, H, W), jnp.float32)

    fwd = jax.jit(fec_forward)
    y = fwd(x, params)
    jax.block_until_ready(y)
    assert y.shape == (B, out_ch, H, W), y.shape

    # Correctness vs f32 reference (loose tolerance: bf16 MXU operands/output).
    y_ref = fec_reference(x, params)
    np.testing.assert_allclose(np.asarray(y), np.asarray(y_ref),
                               atol=5e-2, rtol=5e-2)
    print("KERNEL_OK")
</pallas_src>

<mosaic_0001>
module attributes {stable_mosaic.version = 11 : i64} {
  func.func @_fec_kernel(%arg0: i32, %arg1: i32, %arg2: memref<1x18x72xf32, #tpu.memory_space<vmem>>, %arg3: memref<3x72x512xbf16, #tpu.memory_space<vmem>>, %arg4: memref<512x512xbf16, #tpu.memory_space<vmem>>, %arg5: memref<8x512xf32, #tpu.memory_space<vmem>>, %arg6: memref<1x1x8x512xbf16, #tpu.memory_space<vmem>>) attributes {dimension_semantics = [#tpu.dimension_semantics<parallel>, #tpu.dimension_semantics<parallel>], iteration_bounds = array<i64: 2, 2>, scalar_prefetch = 0 : i64, scratch_operands = 0 : i64, tpu.core_type = #tpu.core_type<tc>, window_params = [{transform_indices = @transform_0, window_bounds = array<i64: 1, 18, 72>}, {pipeline_mode = #tpu.pipeline_mode<synchronous>, transform_indices = @transform_1, window_bounds = array<i64: 3, 72, 512>}, {pipeline_mode = #tpu.pipeline_mode<synchronous>, transform_indices = @transform_2, window_bounds = array<i64: 512, 512>}, {pipeline_mode = #tpu.pipeline_mode<synchronous>, transform_indices = @transform_3, window_bounds = array<i64: 8, 512>}, {transform_indices = @transform_4, window_bounds = array<i64: 1, 1, 8, 512>}]} {
    %c8_i32 = arith.constant 8 : i32
    %0 = arith.muli %arg1, %c8_i32 : i32
    %1 = tpu.assume_multiple %0, 8 : i32
    %c0 = arith.constant 0 : index
    %2 = arith.index_cast %1 : i32 to index
    %c0_0 = arith.constant 0 : index
    %3 = vector.load %arg2[%c0, %2, %c0_0] : memref<1x18x72xf32, #tpu.memory_space<vmem>>, vector<1x10x72xf32>
    %4 = vector.shape_cast %3 : vector<1x10x72xf32> to vector<10x72xf32>
    %5 = vector.extract_strided_slice %4 {offsets = [0, 0], sizes = [8, 72], strides = [1, 1]} : vector<10x72xf32> to vector<8x72xf32>
    %6 = arith.truncf %5 : vector<8x72xf32> to vector<8x72xbf16>
    %c0_1 = arith.constant 0 : index
    %c0_2 = arith.constant 0 : index
    %c0_3 = arith.constant 0 : index
    %7 = vector.load %arg3[%c0_1, %c0_2, %c0_3] : memref<3x72x512xbf16, #tpu.memory_space<vmem>>, vector<1x72x512xbf16>
    %8 = vector.shape_cast %7 : vector<1x72x512xbf16> to vector<72x512xbf16>
    %cst = arith.constant dense<0.000000e+00> : vector<8x512xf32>
    %9 = tpu.matmul %6, %8, %cst {dimension_numbers = #tpu.dot_dimension_numbers<[1], [0], [0], [1], [0, 0, 1, 1], [], []>} : vector<8x72xbf16>, vector<72x512xbf16>, vector<8x512xf32> -> vector<8x512xf32>
    %10 = vector.extract_strided_slice %4 {offsets = [1, 0], sizes = [8, 72], strides = [1, 1]} : vector<10x72xf32> to vector<8x72xf32>
    %11 = arith.truncf %10 : vector<8x72xf32> to vector<8x72xbf16>
    %c1 = arith.constant 1 : index
    %c0_4 = arith.constant 0 : index
    %c0_5 = arith.constant 0 : index
    %12 = vector.load %arg3[%c1, %c0_4, %c0_5] : memref<3x72x512xbf16, #tpu.memory_space<vmem>>, vector<1x72x512xbf16>
    %13 = vector.shape_cast %12 : vector<1x72x512xbf16> to vector<72x512xbf16>
    %cst_6 = arith.constant dense<0.000000e+00> : vector<8x512xf32>
    %14 = tpu.matmul %11, %13, %cst_6 {dimension_numbers = #tpu.dot_dimension_numbers<[1], [0], [0], [1], [0, 0, 1, 1], [], []>} : vector<8x72xbf16>, vector<72x512xbf16>, vector<8x512xf32> -> vector<8x512xf32>
    %15 = arith.addf %9, %14 : vector<8x512xf32>
    %16 = vector.extract_strided_slice %4 {offsets = [2, 0], sizes = [8, 72], strides = [1, 1]} : vector<10x72xf32> to vector<8x72xf32>
    %17 = arith.truncf %16 : vector<8x72xf32> to vector<8x72xbf16>
    %c2 = arith.constant 2 : index
    %c0_7 = arith.constant 0 : index
    %c0_8 = arith.constant 0 : index
    %18 = vector.load %arg3[%c2, %c0_7, %c0_8] : memref<3x72x512xbf16, #tpu.memory_space<vmem>>, vector<1x72x512xbf16>
    %19 = vector.shape_cast %18 : vector<1x72x512xbf16> to vector<72x512xbf16>
    %cst_9 = arith.constant dense<0.000000e+00> : vector<8x512xf32>
    %20 = tpu.matmul %17, %19, %cst_9 {dimension_numbers = #tpu.dot_dimension_numbers<[1], [0], [0], [1], [0, 0, 1, 1], [], []>} : vector<8x72xbf16>, vector<72x512xbf16>, vector<8x512xf32> -> vector<8x512xf32>
    %21 = arith.addf %15, %20 : vector<8x512xf32>
    %c0_10 = arith.constant 0 : index
    %c0_11 = arith.constant 0 : index
    %22 = vector.load %arg5[%c0_10, %c0_11] : memref<8x512xf32, #tpu.memory_space<vmem>>, vector<1x512xf32>
    %c1_12 = arith.constant 1 : index
    %c0_13 = arith.constant 0 : index
    %23 = vector.load %arg5[%c1_12, %c0_13] : memref<8x512xf32, #tpu.memory_space<vmem>>, vector<1x512xf32>
    %c2_14 = arith.constant 2 : index
    %c0_15 = arith.constant 0 : index
    %24 = vector.load %arg5[%c2_14, %c0_15] : memref<8x512xf32, #tpu.memory_space<vmem>>, vector<1x512xf32>
    %25 = vector.broadcast %22 : vector<1x512xf32> to vector<8x512xf32>
    %26 = arith.mulf %21, %25 : vector<8x512xf32>
    %27 = vector.broadcast %23 : vector<1x512xf32> to vector<8x512xf32>
    %28 = arith.addf %26, %27 : vector<8x512xf32>
    %cst_16 = arith.constant 0.000000e+00 : f32
    %29 = vector.broadcast %cst_16 : f32 to vector<8x512xf32>
    %30 = arith.maximumf %28, %29 : vector<8x512xf32>
    %31 = arith.truncf %30 : vector<8x512xf32> to vector<8x512xbf16>
    %c0_17 = arith.constant 0 : index
    %c0_18 = arith.constant 0 : index
    %32 = vector.load %arg4[%c0_17, %c0_18] : memref<512x512xbf16, #tpu.memory_space<vmem>>, vector<512x512xbf16>
    %cst_19 = arith.constant dense<0.000000e+00> : vector<8x512xf32>
    %33 = tpu.matmul %31, %32, %cst_19 {dimension_numbers = #tpu.dot_dimension_numbers<[1], [0], [0], [1], [0, 0, 1, 1], [], []>} : vector<8x512xbf16>, vector<512x512xbf16>, vector<8x512xf32> -> vector<8x512xf32>
    %34 = arith.addf %33, %21 : vector<8x512xf32>
    %35 = vector.broadcast %24 : vector<1x512xf32> to vector<8x512xf32>
    %36 = arith.addf %34, %35 : vector<8x512xf32>
    %cst_20 = arith.constant 0.000000e+00 : f32
    %37 = vector.broadcast %cst_20 : f32 to vector<8x512xf32>
    %38 = arith.maximumf %36, %37 : vector<8x512xf32>
    %39 = arith.truncf %38 : vector<8x512xf32> to vector<8x512xbf16>
    %c0_21 = arith.constant 0 : index
    %c0_22 = arith.constant 0 : index
    %c0_23 = arith.constant 0 : index
    %c0_24 = arith.constant 0 : index
    %40 = vector.load %arg6[%c0_21, %c0_22, %c0_23, %c0_24] : memref<1x1x8x512xbf16, #tpu.memory_space<vmem>>, vector<1x1x8x512xbf16>
    %41 = vector.shape_cast %40 : vector<1x1x8x512xbf16> to vector<8x512xbf16>
    %42 = vector.shape_cast %39 : vector<8x512xbf16> to vector<1x1x8x512xbf16>
    tpu.vector_store %arg6[%c0_21, %c0_22, %c0_23, %c0_24], %42 {strides = array<i32>} : memref<1x1x8x512xbf16, #tpu.memory_space<vmem>>, vector<1x1x8x512xbf16>,
    return
  }
  func.func @transform_0(%arg0: i32, %arg1: i32) -> (i32, i32, i32) {
    %c0_i32 = arith.constant 0 : i32
    %c0_i32_0 = arith.constant 0 : i32
    %c0_i32_1 = arith.constant 0 : i32
    return %arg0, %c0_i32, %c0_i32_0 : i32, i32, i32
  }
  func.func @transform_1(%arg0: i32, %arg1: i32) -> (i32, i32, i32) {
    %c0_i32 = arith.constant 0 : i32
    %c0_i32_0 = arith.constant 0 : i32
    %c0_i32_1 = arith.constant 0 : i32
    %c0_i32_2 = arith.constant 0 : i32
    return %c0_i32, %c0_i32_0, %c0_i32_1 : i32, i32, i32
  }
  func.func @transform_2(%arg0: i32, %arg1: i32) -> (i32, i32) {
    %c0_i32 = arith.constant 0 : i32
    %c0_i32_0 = arith.constant 0 : i32
    %c0_i32_1 = arith.constant 0 : i32
    return %c0_i32, %c0_i32_0 : i32, i32
  }
  func.func @transform_3(%arg0: i32, %arg1: i32) -> (i32, i32) {
    %c0_i32 = arith.constant 0 : i32
    %c0_i32_0 = arith.constant 0 : i32
    %c0_i32_1 = arith.constant 0 : i32
    return %c0_i32, %c0_i32_0 : i32, i32
  }
  func.func @transform_4(%arg0: i32, %arg1: i32) -> (i32, i32, i32, i32) {
    %c0_i32 = arith.constant 0 : i32
    %c0_i32_0 = arith.constant 0 : i32
    %c0_i32_1 = arith.constant 0 : i32
    return %arg0, %arg1, %c0_i32, %c0_i32_0 : i32, i32, i32, i32
  }
}

</mosaic_0001>

<bundles_post_ra>
// kernel: tile.18
= control target key start
LH: loop header
LB: loop body
LE: loop exit
PB: predicated region body
PF: predicated region fallthrough
CT: control target
= control target key end

     0   :  { %s28_s0 = inlined_call_operand.vmem [shape: f32[32], index: 0, kind: input, shape index: {}]   ;;  %s29_s1 = inlined_call_operand.vmem [shape: f32[16,32], index: 1, kind: output, shape index: {}]  }
   0x1   :  { %v4_v0 = vld [vmem:[%s28_s0] ss:$0 sm:$0xff] }
   0x2   :  { %5 = vst [vmem:[%s29_s1] sm:$0xff] %v4_v0  ;;  %8 = vst [vmem:[%s29_s1 + $0x8] sm:$0xff] %v4_v0 }

// kernel: fec_forward.1
= control target key start
LH: loop header
LB: loop body
LE: loop exit
PB: predicated region body
PF: predicated region fallthrough
CT: control target
= control target key end

     0   :  { %s2643_s15 = smov 0   ;;  %s2645_s16 = smov 0   ;;  %s3336_s0 = inlined_call_operand.vmem [shape: f32[2,18,72], index: 0, kind: input, shape index: {}]   ;;  %s3337_s1 = inlined_call_operand.vmem [shape: bf16[3,72,512], index: 1, kind: input, shape index: {}]   ;;  %s3338_s2 = inlined_call_operand.vmem [shape: bf16[512,512], index: 2, kind: input, shape index: {}]   ;;  %s3339_s3 = inlined_call_operand.vmem [shape: f32[8,512], index: 3, kind: input, shape index: {}]   ;;  %s3340_s4 = inlined_call_operand.vmem [shape: bf16[2,2,8,512], index: 4, kind: output, shape index: {}]  }
   0x1   :  { %s2647_s17 = smov 0   ;;  %s2649_s18 = smov 0  }
   0x2   :  { %s2651_s19 = smov 0  }
   0x3 LB: > { %s23_s20 = sadd.s32 1, %s2607_s17  ;;  %s26_s21 = sadd.s32 1, %s2611_s18  ;;  %s2615_s19 = sphi %s2651_s19, %s14_s19   ;;  %s2611_s18 = sphi %s2649_s18, %s3344_s18   ;;  %s2607_s17 = sphi %s2647_s17, %s3343_s17   ;;  %s2603_s16 = sphi %s2645_s16, %s3342_s16   ;;  %s2599_s15 = sphi %s2643_s15, %s3341_s15  }
   0x4   : > { %p24_p0 = scmp.ge.s32.totalorder %s23_s20, 2  ;;  %p1993_p1 = scmp.ge.s32.totalorder %s2615_s19, 1 }
   0x5   : > { %p176_p2 = scmp.lt.s32.totalorder %s2615_s19, 5 }
   0x6   : > { %s3346_s20 = smov (%p24_p0, %s23_s20), 0  ;;  %s3348_s21 = smov (!%p24_p0, %s26_s21), %s2611_s18 }
   0x7   : > { %p177_p3 = pnand %p1993_p1, %p176_p2  ;;  %p28_p4 = scmp.ge.s32.totalorder %s3348_s21, 2 }
   0x8   : > { %v2301_v0 = vld [vmem:[%s3337_s1 + $0x94] ss:$16 sps:$4 sm:$0xff] (!%p177_p3)   ;;  %v2303_v1 = vld [vmem:[%s3337_s1 + $0x9c] ss:$16 sps:$4 sm:$0xff] (!%p177_p3)   ;;  %v2617_v2 = vmov (!%p177_p3), 0   ;;  %p206_p5 = scmp.lt.s32.totalorder (!%p177_p3), %s2603_s16, 1 }
   0x9   : > { %s3350_s21 = smov (%p28_p4, %s3348_s21), 0  ;;  %180 = sbr.rel (%p177_p3) target bundleno = 581 (0x245), region = 36 }
   0xa   : > { %410 = vmatprep.mubr.bf16.mxu0 (!%p177_p3), %v2617_v2  ;;  %451 = vmatprep.mubr.bf16.mxu1 (!%p177_p3), %v2617_v2  ;;  %v2305_v3 = vld [vmem:[%s3337_s1 + $0x90] ss:$16 sps:$4 sm:$0xff] (!%p177_p3)   ;;  %v2306_v4 = vld [vmem:[%s3337_s1 + $0x98] ss:$16 sps:$4 sm:$0xff] (!%p177_p3)   ;;  %v2307_v5 = vld [vmem:[%s3337_s1 + $0xb4] ss:$16 sps:$4 sm:$0xff] (!%p177_p3)  }
   0xb   : > { %378 = vmatprep.subr.bf16.mxu0 (!%p177_p3), %v2301_v0  ;;  %419 = vmatprep.subr.bf16.mxu1 (!%p177_p3), %v2303_v1  ;;  %v2309_v6 = vld [vmem:[%s3337_s1 + $0xbc] ss:$16 sps:$4 sm:$0xff] (!%p177_p3)   ;;  %v2311_v7 = vld [vmem:[%s3337_s1 + $0xb0] ss:$16 sps:$4 sm:$0xff] (!%p177_p3)   ;;  %v2312_v8 = vld [vmem:[%s3337_s1 + $0xb8] ss:$16 sps:$4 sm:$0xff] (!%p177_p3)  }
   0xc   : > { %379 = vmatpush1.bf16.msra.mxu0 (!%p177_p3), %v2305_v3  ;;  %420 = vmatpush1.bf16.msra.mxu1 (!%p177_p3), %v2306_v4  ;;  %v2313_v9 = vld [vmem:[%s3337_s1 + $0xd4] ss:$16 sps:$4 sm:$0xff] (!%p177_p3)   ;;  %v2315_v10 = vld [vmem:[%s3337_s1 + $0xdc] ss:$16 sps:$4 sm:$0xff] (!%p177_p3)   ;;  %v2317_v11 = vld [vmem:[%s3337_s1 + $0xd0] ss:$16 sps:$4 sm:$0xff] (!%p177_p3)  }
   0xd   : > { %380 = vmatprep.subr.bf16.mxu0 (!%p177_p3), %v2307_v5  ;;  %421 = vmatprep.subr.bf16.mxu1 (!%p177_p3), %v2309_v6  ;;  %v2318_v12 = vld [vmem:[%s3337_s1 + $0xd8] ss:$16 sps:$4 sm:$0xff] (!%p177_p3)   ;;  %v2319_v13 = vld [vmem:[%s3337_s1 + $0xf4] ss:$16 sps:$4 sm:$0xff] (!%p177_p3)   ;;  %s1998_s7 = sshll.u32 (!%p177_p3), %s2599_s15, 3  ;;  %vm365_vm0 = vcmask (!%p177_p3), 1043456  }
   0xe   : > { %v2321_v14 = vld [vmem:[%s3337_s1 + $0xfc] ss:$16 sps:$4 sm:$0xff] (!%p177_p3)   ;;  %v2015_v15 = vld [vmem:[%s3337_s1 + $0x110] sm:$0xff] (!%p177_p3)  ;;  %v2324_v18 = vld [vmem:[%s3337_s1 + $0xf8] ss:$16 sps:$4 sm:$0xff] (!%p177_p3)   ;;  %vm361_vm1 = vcmask (!%p177_p3), 588800  }
   0xf   : > { %v2016_v16 = vld [vmem:[%s3337_s1 + $0x118] sm:$0xff] (!%p177_p3)  ;;  %v2323_v17 = vld [vmem:[%s3337_s1 + $0xf0] ss:$16 sps:$4 sm:$0xff] (!%p177_p3)   ;;  %v2034_v19 = vcombine.high (!%p177_p3), %v2015_v15, %v2015_v15  ;;  %v2033_v21 = vcombine.low (!%p177_p3), %v2015_v15, %v2015_v15  ;;  %v2331_v25 = vld [vmem:[%s3337_s1 + $0x4] ss:$16 sps:$4 sm:$0xff] (!%p177_p3)   ;;  %p213_p6 = scmp.lt.s32.totalorder (!%p177_p3), %s2599_s15, 1 }
  0x10   : > { %s3352_s16 = smov (!%p206_p5, %s2603_s16), 1  ;;  %381 = vmatpush1.bf16.msra.mxu0 %v2311_v7  ;;  %422 = vmatpush1.bf16.msra.mxu1 %v2312_v8  ;;  %v2036_v20 = vcombine.high %v2016_v16, %v2016_v16  ;;  %v2035_v22 = vcombine.low %v2016_v16, %v2016_v16  ;;  %v2334_v27 = vld [vmem:[%s3337_s1 + $0xc] ss:$16 sps:$4 sm:$0xff]   ;;  %v2329_v32 = vld [vmem:[%s3337_s1] ss:$16 sps:$4 sm:$0xff]  }
  0x11   : > { %s2259_s12 = smul.u32 24, %s3352_s16  ;;  %382 = vmatprep.subr.bf16.mxu0 %v2313_v9  ;;  %423 = vmatprep.subr.bf16.mxu1 %v2315_v10  ;;  %v367_v28 = vsel %vm365_vm0, %v2033_v21, 0  ;;  %v2332_v33 = vld [vmem:[%s3337_s1 + $0x8] ss:$16 sps:$4 sm:$0xff]   ;;  %v2337_v35 = vld [vmem:[%s3337_s1 + $0x24] ss:$16 sps:$4 sm:$0xff]  }
  0x12   : > { %v373_v29 = vsel %vm365_vm0, %v2035_v22, 0  ;;  %v2340_v37 = vld [vmem:[%s3337_s1 + $0x2c] ss:$16 sps:$4 sm:$0xff]   ;;  %v2335_v38 = vld [vmem:[%s3337_s1 + $0x20] ss:$16 sps:$4 sm:$0xff]   ;;  %s3354_s15 = smov (!%p213_p6, %s2599_s15), 1 }
  0x13   : > { %s210_s6 = scalar_lea.vmem %s3336_s0, %s2259_s12  ;;  %v2338_v39 = vld [vmem:[%s3337_s1 + $0x28] ss:$16 sps:$4 sm:$0xff]   ;;  %v2343_v40 = vld [vmem:[%s3337_s1 + $0x44] ss:$16 sps:$4 sm:$0xff]   ;;  %v2346_v41 = vld [vmem:[%s3337_s1 + $0x4c] ss:$16 sps:$4 sm:$0xff]  }
  0x14   : > { %s222_s22 = scalar_lea.vmem %s210_s6, %s1998_s7  ;;  %383 = vmatpush1.bf16.msra.mxu0 %v2317_v11  ;;  %424 = vmatpush1.bf16.msra.mxu1 %v2318_v12  ;;  %v2341_v42 = vld [vmem:[%s3337_s1 + $0x40] ss:$16 sps:$4 sm:$0xff]   ;;  %v2344_v43 = vld [vmem:[%s3337_s1 + $0x48] ss:$16 sps:$4 sm:$0xff]   ;;  %v2349_v44 = vld [vmem:[%s3337_s1 + $0x64] ss:$16 sps:$4 sm:$0xff]  }
  0x15   : > { %384 = vmatprep.subr.bf16.mxu0 %v2319_v13  ;;  %425 = vmatprep.subr.bf16.mxu1 %v2321_v14  ;;  %v2738_v23 = vld [vmem:[%s222_s22] sm:$0xff]  ;;  %v224_v24 = vld [vmem:[%s222_s22 + $0x8] sm:$0x3]  ;;  %v2352_v45 = vld [vmem:[%s3337_s1 + $0x6c] ss:$16 sps:$4 sm:$0xff]   ;;  %s1995_s11 = sshll.u32 %s3354_s15, 2 }
  0x16   : > { %v2744_v26 = vpack.c.bf16 %v224_v24, %v2738_v23  ;;  %v242_v46 = vld [vmem:[%s3337_s1 + $0x80] sm:$0xff]  ;;  %v243_v47 = vld [vmem:[%s3337_s1 + $0x88] sm:$0xff]  ;;  %v225_v60 = vpack.c.bf16 %v2738_v23, %v2738_v23  ;;  %s1996_s13 = sshll.u32 %s3352_s16, 3 }
  0x17   : > { %v2347_v48 = vld [vmem:[%s3337_s1 + $0x60] ss:$16 sps:$4 sm:$0xff]   ;;  %v2350_v49 = vld [vmem:[%s3337_s1 + $0x68] ss:$16 sps:$4 sm:$0xff]   ;;  %v2058_v50 = vcombine.high %v242_v46, %v242_v46  ;;  %v2060_v51 = vcombine.high %v243_v47, %v243_v47  ;;  %v2057_v52 = vcombine.low %v242_v46, %v242_v46  ;;  %v2059_v53 = vcombine.low %v243_v47, %v243_v47  ;;  %v2359_v54 = vld [vmem:[%s3337_s1 + $0x124] ss:$16 sps:$4 sm:$0xff]   ;;  %s217_s14 = sadd.s32 %s1996_s13, %s1995_s11 }
  0x18   : > { %385 = vmatpush1.bf16.msra.mxu0 %v2323_v17  ;;  %426 = vmatpush1.bf16.msra.mxu1 %v2324_v18  ;;  %v265_v30 = vshrl.u32 %v2744_v26, 16  ;;  %v267_v31 = vshll.u32 %v2744_v26, 16  ;;  %v2362_v57 = vld [vmem:[%s3337_s1 + $0x12c] ss:$16 sps:$4 sm:$0xff]   ;;  %v2357_v58 = vld [vmem:[%s3337_s1 + $0x120] ss:$16 sps:$4 sm:$0xff]  }
  0x19   : > { %2037 = vmatprep.subr.msk.bf16.mxu0 %vm365_vm0, %v2034_v19  ;;  %2039 = vmatprep.subr.msk.bf16.mxu1 %vm365_vm0, %v2036_v20  ;;  %v554_v55 = vsel %vm365_vm0, %v2057_v52, 0  ;;  %v560_v56 = vsel %vm365_vm0, %v2059_v53, 0  ;;  %v2360_v59 = vld [vmem:[%s3337_s1 + $0x128] ss:$16 sps:$4 sm:$0xff]   ;;  %v2365_v61 = vld [vmem:[%s3337_s1 + $0x144] ss:$16 sps:$4 sm:$0xff]  }
  0x1a   : > { %v269_v34 = vrot.slane %v267_v31, 1  ;;  %v2368_v62 = vld [vmem:[%s3337_s1 + $0x14c] ss:$16 sps:$4 sm:$0xff]   ;;  %v2363_v63 = vld [vmem:[%s3337_s1 + $0x140] ss:$16 sps:$4 sm:$0xff]   ;;  %v667_v19 = vrot.slane %v2744_v26, 1 }
  0x1b   : > { %v2366_v0 = vld [vmem:[%s3337_s1 + $0x148] ss:$16 sps:$4 sm:$0xff]   ;;  %v2371_v1 = vld [vmem:[%s3337_s1 + $0x164] ss:$16 sps:$4 sm:$0xff]   ;;  %v2374_v3 = vld [vmem:[%s3337_s1 + $0x16c] ss:$16 sps:$4 sm:$0xff]  }
  0x1c   : > { %387 = vmatpush1.bf16.msra.mxu0 %v367_v28  ;;  %428 = vmatpush1.bf16.msra.mxu1 %v373_v29  ;;  %v270_v36 = vor.u32 %v269_v34, %v265_v30  ;;  %v2369_v4 = vld [vmem:[%s3337_s1 + $0x160] ss:$16 sps:$4 sm:$0xff]   ;;  %v2372_v5 = vld [vmem:[%s3337_s1 + $0x168] ss:$16 sps:$4 sm:$0xff]   ;;  %v2377_v6 = vld [vmem:[%s3337_s1 + $0x184] ss:$16 sps:$4 sm:$0xff]  }
  0x1d   : > { %565 = vmatprep.subr.bf16.mxu0 %v2331_v25  ;;  %606 = vmatprep.subr.bf16.mxu1 %v2334_v27  ;;  %v2380_v7 = vld [vmem:[%s3337_s1 + $0x18c] ss:$16 sps:$4 sm:$0xff]   ;;  %v2375_v9 = vld [vmem:[%s3337_s1 + $0x180] ss:$16 sps:$4 sm:$0xff]   ;;  %v2378_v10 = vld [vmem:[%s3337_s1 + $0x188] ss:$16 sps:$4 sm:$0xff]  }
  0x1e   : > { %v2082_v8 = vld [vmem:[%s3337_s1 + $0x1a8] sm:$0xff]  ;;  %v2387_v15 = vld [vmem:[%s3338_s2 + $0x4] ss:$16 sps:$4 sm:$0xff]   ;;  %v2385_v20 = vld [vmem:[%s3338_s2] ss:$16 sps:$4 sm:$0xff]   ;;  %s1997_s15 = sshll.u32 %s217_s14, 2 }
  0x1f   : > { %2038 = vmatmul.mubr.msk.bf16.vlgmr.msra.gmra.mrb[0].mxu0 %vm361_vm1, %v270_v36  ;;  %2040 = vmatmul.mubr.msk.bf16.vlgmr.msra.gmra.mrb[0].mxu1 %vm361_vm1, %v270_v36  ;;  %v2102_v12 = vcombine.high %v2082_v8, %v2082_v8  ;;  %v2101_v14 = vcombine.low %v2082_v8, %v2082_v8  ;;  %v2390_v18 = vld [vmem:[%s3338_s2 + $0x204] ss:$16 sps:$4 sm:$0xff]   ;;  %v2388_v21 = vld [vmem:[%s3338_s2 + $0x200] ss:$16 sps:$4 sm:$0xff]   ;;  %s219_s23 = scalar_lea.vmem %s3340_s4, %s1997_s15 }
  0x20   : > { %566 = vmatpush1.bf16.msra.mxu0 %v2329_v32  ;;  %607 = vmatpush1.bf16.msra.mxu1 %v2332_v33  ;;  %v2393_v22 = vld [vmem:[%s3338_s2 + $0x24] ss:$16 sps:$4 sm:$0xff]   ;;  %v2391_v24 = vld [vmem:[%s3338_s2 + $0x20] ss:$16 sps:$4 sm:$0xff]  }
  0x21   : > { %567 = vmatprep.subr.bf16.mxu0 %v2337_v35  ;;  %608 = vmatprep.subr.bf16.mxu1 %v2340_v37  ;;  %v768_v17 = vsel %vm365_vm0, %v2101_v14, 0  ;;  %v2396_v23 = vld [vmem:[%s3338_s2 + $0x224] ss:$16 sps:$4 sm:$0xff]   ;;  %v2394_v25 = vld [vmem:[%s3338_s2 + $0x220] ss:$16 sps:$4 sm:$0xff]  }
  0x22   : > { %597 = vmatprep.mubr.bf16.mxu0 %v2617_v2  ;;  %638 = vmatprep.mubr.bf16.mxu1 %v2617_v2  ;;  %v2399_v26 = vld [vmem:[%s3338_s2 + $0x44] ss:$16 sps:$4 sm:$0xff]   ;;  %v2397_v28 = vld [vmem:[%s3338_s2 + $0x40] ss:$16 sps:$4 sm:$0xff]  }
  0x23   : > { %v2402_v27 = vld [vmem:[%s3338_s2 + $0x244] ss:$16 sps:$4 sm:$0xff]   ;;  %v2400_v29 = vld [vmem:[%s3338_s2 + $0x240] ss:$16 sps:$4 sm:$0xff]  }
  0x24   : > { %568 = vmatpush1.bf16.msra.mxu0 %v2335_v38  ;;  %609 = vmatpush1.bf16.msra.mxu1 %v2338_v39  ;;  %v2405_v30 = vld [vmem:[%s3338_s2 + $0x64] ss:$16 sps:$4 sm:$0xff]   ;;  %v2403_v32 = vld [vmem:[%s3338_s2 + $0x60] ss:$16 sps:$4 sm:$0xff]  }
  0x25   : > { %569 = vmatprep.subr.bf16.mxu0 %v2343_v40  ;;  %610 = vmatprep.subr.bf16.mxu1 %v2346_v41  ;;  %v2408_v31 = vld [vmem:[%s3338_s2 + $0x264] ss:$16 sps:$4 sm:$0xff]   ;;  %v2406_v33 = vld [vmem:[%s3338_s2 + $0x260] ss:$16 sps:$4 sm:$0xff]  }
  0x26   : > { %v2411_v34 = vld [vmem:[%s3338_s2 + $0x84] ss:$16 sps:$4 sm:$0xff]   ;;  %v2409_v36 = vld [vmem:[%s3338_s2 + $0x80] ss:$16 sps:$4 sm:$0xff]  }
  0x27   : > { %v2414_v35 = vld [vmem:[%s3338_s2 + $0x284] ss:$16 sps:$4 sm:$0xff]   ;;  %v2412_v37 = vld [vmem:[%s3338_s2 + $0x280] ss:$16 sps:$4 sm:$0xff]  }
  0x28   : > { %570 = vmatpush1.bf16.msra.mxu0 %v2341_v42  ;;  %611 = vmatpush1.bf16.msra.mxu1 %v2344_v43  ;;  %v2417_v38 = vld [vmem:[%s3338_s2 + $0xa4] ss:$16 sps:$4 sm:$0xff]   ;;  %v2415_v40 = vld [vmem:[%s3338_s2 + $0xa0] ss:$16 sps:$4 sm:$0xff]  }
  0x29   : > { %571 = vmatprep.subr.bf16.mxu0 %v2349_v44  ;;  %612 = vmatprep.subr.bf16.mxu1 %v2352_v45  ;;  %v2420_v39 = vld [vmem:[%s3338_s2 + $0x2a4] ss:$16 sps:$4 sm:$0xff]   ;;  %v2418_v41 = vld [vmem:[%s3338_s2 + $0x2a0] ss:$16 sps:$4 sm:$0xff]  }
  0x2a   : > { %v2423_v42 = vld [vmem:[%s3338_s2 + $0xc4] ss:$16 sps:$4 sm:$0xff]   ;;  %v2421_v44 = vld [vmem:[%s3338_s2 + $0xc0] ss:$16 sps:$4 sm:$0xff]  }
  0x2b   : > { %v2426_v43 = vld [vmem:[%s3338_s2 + $0x2c4] ss:$16 sps:$4 sm:$0xff]   ;;  %v2424_v45 = vld [vmem:[%s3338_s2 + $0x2c0] ss:$16 sps:$4 sm:$0xff]  }
  0x2c   : > { %572 = vmatpush1.bf16.msra.mxu0 %v2347_v48  ;;  %613 = vmatpush1.bf16.msra.mxu1 %v2350_v49  ;;  %v2429_v46 = vld [vmem:[%s3338_s2 + $0xe4] ss:$16 sps:$4 sm:$0xff]   ;;  %v2427_v48 = vld [vmem:[%s3338_s2 + $0xe0] ss:$16 sps:$4 sm:$0xff]  }
  0x2d   : > { %2061 = vmatprep.subr.msk.bf16.mxu0 %vm365_vm0, %v2058_v50  ;;  %2063 = vmatprep.subr.msk.bf16.mxu1 %vm365_vm0, %v2060_v51  ;;  %v2432_v47 = vld [vmem:[%s3338_s2 + $0x2e4] ss:$16 sps:$4 sm:$0xff]   ;;  %v2430_v49 = vld [vmem:[%s3338_s2 + $0x2e0] ss:$16 sps:$4 sm:$0xff]  }
  0x2e   : > { %v2435_v50 = vld [vmem:[%s3338_s2 + $0x104] ss:$16 sps:$4 sm:$0xff]   ;;  %v2433_v52 = vld [vmem:[%s3338_s2 + $0x100] ss:$16 sps:$4 sm:$0xff]  }
  0x2f   : > { %v2438_v51 = vld [vmem:[%s3338_s2 + $0x304] ss:$16 sps:$4 sm:$0xff]   ;;  %v2436_v53 = vld [vmem:[%s3338_s2 + $0x300] ss:$16 sps:$4 sm:$0xff]  }
  0x30   : > { %574 = vmatpush1.bf16.msra.mxu0 %v554_v55  ;;  %615 = vmatpush1.bf16.msra.mxu1 %v560_v56  ;;  %v2444_v55 = vld [vmem:[%s3338_s2 + $0x324] ss:$16 sps:$4 sm:$0xff]   ;;  %v2439_v56 = vld [vmem:[%s3338_s2 + $0x120] ss:$16 sps:$4 sm:$0xff]  }
  0x31   : > { %773 = vmatprep.subr.bf16.mxu0 %v2359_v54  ;;  %814 = vmatprep.subr.bf16.mxu1 %v2362_v57  ;;  %v2441_v54 = vld [vmem:[%s3338_s2 + $0x124] ss:$16 sps:$4 sm:$0xff]   ;;  %v2442_v57 = vld [vmem:[%s3338_s2 + $0x320] ss:$16 sps:$4 sm:$0xff]  }
  0x32   : > { %v2463_v8 = vld [vmem:[%s3338_s2 + $0x1a0] ss:$16 sps:$4 sm:$0xff]   ;;  %v2477_v14 = vld [vmem:[%s3338_s2 + $0x1e4] ss:$16 sps:$4 sm:$0xff]  }
  0x33   : > { %2062 = vmatmul.mubr.msk.bf16.vlgmr.msra.gmra.mrb[0].mxu0 %vm361_vm1, %v225_v60  ;;  %2064 = vmatmul.mubr.msk.bf16.vlgmr.msra.gmra.mrb[0].mxu1 %vm361_vm1, %v225_v60  ;;  %v2445_v60 = vld [vmem:[%s3338_s2 + $0x140] ss:$16 sps:$4 sm:$0xff]  }
  0x34   : > { %774 = vmatpush1.bf16.msra.mxu0 %v2357_v58  ;;  %815 = vmatpush1.bf16.msra.mxu1 %v2360_v59  ;;  %v2447_v58 = vld [vmem:[%s3338_s2 + $0x144] ss:$16 sps:$4 sm:$0xff]  }
  0x35   : > { %775 = vmatprep.subr.bf16.mxu0 %v2365_v61  ;;  %816 = vmatprep.subr.bf16.mxu1 %v2368_v62  ;;  %v2450_v59 = vld [vmem:[%s3338_s2 + $0x344] ss:$16 sps:$4 sm:$0xff]   ;;  %v2448_v61 = vld [vmem:[%s3338_s2 + $0x340] ss:$16 sps:$4 sm:$0xff]  }
  0x36   : > { %805 = vmatprep.mubr.bf16.mxu0 %v2617_v2  ;;  %846 = vmatprep.mubr.bf16.mxu1 %v2617_v2  ;;  %v2081_v2 = vld [vmem:[%s3337_s1 + $0x1a0] sm:$0xff] }
  0x37   : > { %v2100_v11 = vcombine.high %v2081_v2, %v2081_v2  ;;  %v2099_v13 = vcombine.low %v2081_v2, %v2081_v2  ;;  %v2453_v62 = vld [vmem:[%s3338_s2 + $0x164] ss:$16 sps:$4 sm:$0xff]  }
  0x38   : > { %776 = vmatpush1.bf16.msra.mxu0 %v2363_v63  ;;  %817 = vmatpush1.bf16.msra.mxu1 %v2366_v0  ;;  %v2456_v63 = vld [vmem:[%s3338_s2 + $0x364] ss:$16 sps:$4 sm:$0xff]   ;;  %v2451_v0 = vld [vmem:[%s3338_s2 + $0x160] ss:$16 sps:$4 sm:$0xff]  }
  0x39   : > { %777 = vmatprep.subr.bf16.mxu0 %v2371_v1  ;;  %818 = vmatprep.subr.bf16.mxu1 %v2374_v3  ;;  %v762_v16 = vsel %vm365_vm0, %v2099_v13, 0  ;;  %v2454_v1 = vld [vmem:[%s3338_s2 + $0x360] ss:$16 sps:$4 sm:$0xff]   ;;  %v2459_v3 = vld [vmem:[%s3338_s2 + $0x184] ss:$16 sps:$4 sm:$0xff]  }
  0x3a   : > { %v2468_v2 = vld [vmem:[%s3338_s2 + $0x3a4] ss:$16 sps:$4 sm:$0xff]  }
  0x3b   : > { %v2474_v13 = vld [vmem:[%s3338_s2 + $0x3c4] ss:$16 sps:$4 sm:$0xff]  }
  0x3c   : > { %778 = vmatpush1.bf16.msra.mxu0 %v2369_v4  ;;  %819 = vmatpush1.bf16.msra.mxu1 %v2372_v5  ;;  %v2462_v4 = vld [vmem:[%s3338_s2 + $0x384] ss:$16 sps:$4 sm:$0xff]   ;;  %v2457_v5 = vld [vmem:[%s3338_s2 + $0x180] ss:$16 sps:$4 sm:$0xff]  }
  0x3d   : > { %779 = vmatprep.subr.bf16.mxu0 %v2377_v6  ;;  %820 = vmatprep.subr.bf16.mxu1 %v2380_v7  ;;  %v2460_v6 = vld [vmem:[%s3338_s2 + $0x380] ss:$16 sps:$4 sm:$0xff]   ;;  %v2465_v7 = vld [vmem:[%s3338_s2 + $0x1a4] ss:$16 sps:$4 sm:$0xff]  }
  0x40   : > { %780 = vmatpush1.bf16.msra.mxu0 %v2375_v9  ;;  %821 = vmatpush1.bf16.msra.mxu1 %v2378_v10  ;;  %v2466_v9 = vld [vmem:[%s3338_s2 + $0x3a0] ss:$16 sps:$4 sm:$0xff]   ;;  %v2471_v10 = vld [vmem:[%s3338_s2 + $0x1c4] ss:$16 sps:$4 sm:$0xff]  }
  0x41   : > { %2103 = vmatprep.subr.msk.bf16.mxu0 %vm365_vm0, %v2100_v11  ;;  %2105 = vmatprep.subr.msk.bf16.mxu1 %vm365_vm0, %v2102_v12  ;;  %v2469_v11 = vld [vmem:[%s3338_s2 + $0x1c0] ss:$16 sps:$4 sm:$0xff]  }
  0x42   : > { %v2472_v12 = vld [vmem:[%s3338_s2 + $0x3c0] ss:$16 sps:$4 sm:$0xff]  }
  0x44   : > { %782 = vmatpush1.bf16.msra.mxu0 %v762_v16  ;;  %823 = vmatpush1.bf16.msra.mxu1 %v768_v17  ;;  %v2475_v16 = vld [vmem:[%s3338_s2 + $0x1e0] ss:$16 sps:$4 sm:$0xff]  }
  0x45   : > { %1690 = vmatprep.subr.bf16.mxu0 %v2387_v15  ;;  %1731 = vmatprep.subr.bf16.mxu1 %v2390_v18  ;;  %v2480_v15 = vld [vmem:[%s3338_s2 + $0x3e4] ss:$16 sps:$4 sm:$0xff]   ;;  %v2478_v17 = vld [vmem:[%s3338_s2 + $0x3e0] ss:$16 sps:$4 sm:$0xff]   ;;  %v2483_v18 = vld [vmem:[%s3338_s2 + $0xc] ss:$16 sps:$4 sm:$0xff]  }
  0x47   : > { %2104 = vmatmul.mubr.msk.bf16.vlgmr.msra.gmra.mrb[0].mxu0 %vm361_vm1, %v667_v19  ;;  %2106 = vmatmul.mubr.msk.bf16.vlgmr.msra.gmra.mrb[0].mxu1 %vm361_vm1, %v667_v19  ;;  %v2486_v19 = vld [vmem:[%s3338_s2 + $0x20c] ss:$16 sps:$4 sm:$0xff]  }
  0x48   : > { %1691 = vmatpush1.bf16.msra.mxu0 %v2385_v20  ;;  %1732 = vmatpush1.bf16.msra.mxu1 %v2388_v21  ;;  %v865_v20 = vlaneseq }
  0x49   : > { %1692 = vmatprep.subr.bf16.mxu0 %v2393_v22  ;;  %1733 = vmatprep.subr.bf16.mxu1 %v2396_v23 }
  0x4a   : > { %v866_v21 = vshrl.u32 %v865_v20, 7  ;;  %v2517_v20 = vld [vmem:[%s3338_s2 + $0xc8] ss:$16 sps:$4 sm:$0xff]  }
  0x4c   : > { %1693 = vmatpush1.bf16.msra.mxu0 %v2391_v24  ;;  %1734 = vmatpush1.bf16.msra.mxu1 %v2394_v25  ;;  %v3076_v22 = vsub.s32 0, %v866_v21  ;;  %v3078_v23 = vsub.s32 2, %v866_v21  ;;  %v859_v24 = vld [vmem:[%s3339_s3] ss:$8 sm:$0xf]  ;;  %v3083_v25 = vsub.s32 1, %v866_v21 }
  0x4d   : > { %1694 = vmatprep.subr.bf16.mxu0 %v2399_v26  ;;  %1735 = vmatprep.subr.bf16.mxu1 %v2402_v27  ;;  %v3085_v26 = vsub.s32 3, %v866_v21  ;;  %v2107_v27 = vld [vmem:[%s3339_s3 + $0x1] ss:$8 sm:$0xf] }
  0x4e   : > { %v2520_v21 = vld [vmem:[%s3338_s2 + $0x2c8] ss:$16 sps:$4 sm:$0xff]  }
  0x50   : > { %1695 = vmatpush1.bf16.msra.mxu0 %v2397_v28  ;;  %1736 = vmatpush1.bf16.msra.mxu1 %v2400_v29  ;;  %v868_v28 = vrot.slane %v859_v24, %v3076_v22  ;;  %v876_v29 = vrot.slane %v859_v24, %v3078_v23 }
  0x51   : > { %1696 = vmatprep.subr.bf16.mxu0 %v2405_v30  ;;  %1737 = vmatprep.subr.bf16.mxu1 %v2408_v31  ;;  %v872_v30 = vrot.slane %v859_v24, %v3083_v25  ;;  %v880_v31 = vrot.slane %v859_v24, %v3085_v26  ;;  %v2525_v24 = vld [vmem:[%s3338_s2 + $0xec] ss:$16 sps:$4 sm:$0xff]  }
  0x54   : > { %1697 = vmatpush1.bf16.msra.mxu0 %v2403_v32  ;;  %1738 = vmatpush1.bf16.msra.mxu1 %v2406_v33  ;;  %v893_v32 = vrot.slane %v2107_v27, %v3076_v22  ;;  %v901_v33 = vrot.slane %v2107_v27, %v3078_v23 }
  0x55   : > { %1698 = vmatprep.subr.bf16.mxu0 %v2411_v34  ;;  %1739 = vmatprep.subr.bf16.mxu1 %v2414_v35 }
  0x58   : > { %1699 = vmatpush1.bf16.msra.mxu0 %v2409_v36  ;;  %1740 = vmatpush1.bf16.msra.mxu1 %v2412_v37  ;;  %v897_v36 = vrot.slane %v2107_v27, %v3083_v25  ;;  %v905_v37 = vrot.slane %v2107_v27, %v3085_v26  ;;  %v2528_v27 = vld [vmem:[%s3338_s2 + $0x2ec] ss:$16 sps:$4 sm:$0xff]  }
  0x59   : > { %1700 = vmatprep.subr.bf16.mxu0 %v2417_v38  ;;  %1741 = vmatprep.subr.bf16.mxu1 %v2420_v39 }
  0x5c   : > { %1701 = vmatpush1.bf16.msra.mxu0 %v2415_v40  ;;  %1742 = vmatpush1.bf16.msra.mxu1 %v2418_v41 }
  0x5d   : > { %1702 = vmatprep.subr.bf16.mxu0 %v2423_v42  ;;  %1743 = vmatprep.subr.bf16.mxu1 %v2426_v43 }
  0x60   : > { %1703 = vmatpush1.bf16.msra.mxu0 %v2421_v44  ;;  %1744 = vmatpush1.bf16.msra.mxu1 %v2424_v45 }
  0x61   : > { %1704 = vmatprep.subr.bf16.mxu0 %v2429_v46  ;;  %1745 = vmatprep.subr.bf16.mxu1 %v2432_v47 }
  0x64   : > { %1705 = vmatpush1.bf16.msra.mxu0 %v2427_v48  ;;  %1746 = vmatpush1.bf16.msra.mxu1 %v2430_v49 }
  0x65   : > { %1706 = vmatprep.subr.bf16.mxu0 %v2435_v50  ;;  %1747 = vmatprep.subr.bf16.mxu1 %v2438_v51 }
  0x68   : > { %1707 = vmatpush1.bf16.msra.mxu0 %v2433_v52  ;;  %1748 = vmatpush1.bf16.msra.mxu1 %v2436_v53 }
  0x69   : > { %1708 = vmatprep.subr.bf16.mxu0 %v2441_v54  ;;  %1749 = vmatprep.subr.bf16.mxu1 %v2444_v55 }
  0x6c   : > { %1709 = vmatpush1.bf16.msra.mxu0 %v2439_v56  ;;  %1750 = vmatpush1.bf16.msra.mxu1 %v2442_v57 }
  0x6d   : > { %1710 = vmatprep.subr.bf16.mxu0 %v2447_v58  ;;  %1751 = vmatprep.subr.bf16.mxu1 %v2450_v59  ;;  %v2481_v58 = vld [vmem:[%s3338_s2 + $0x8] ss:$16 sps:$4 sm:$0xff]  }
  0x6e   : > { %v2484_v59 = vld [vmem:[%s3338_s2 + $0x208] ss:$16 sps:$4 sm:$0xff]  }
  0x70   : > { %1711 = vmatpush1.bf16.msra.mxu0 %v2445_v60  ;;  %1752 = vmatpush1.bf16.msra.mxu1 %v2448_v61 }
  0x71   : > { %1712 = vmatprep.subr.bf16.mxu0 %v2453_v62  ;;  %1753 = vmatprep.subr.bf16.mxu1 %v2456_v63  ;;  %v2489_v62 = vld [vmem:[%s3338_s2 + $0x2c] ss:$16 sps:$4 sm:$0xff]  }
  0x72   : > { %v2492_v63 = vld [vmem:[%s3338_s2 + $0x22c] ss:$16 sps:$4 sm:$0xff]  }
  0x74   : > { %1713 = vmatpush1.bf16.msra.mxu0 %v2451_v0  ;;  %1754 = vmatpush1.bf16.msra.mxu1 %v2454_v1  ;;  %v2487_v0 = vld [vmem:[%s3338_s2 + $0x28] ss:$16 sps:$4 sm:$0xff]  }
  0x75   : > { %1714 = vmatprep.subr.bf16.mxu0 %v2459_v3  ;;  %1755 = vmatprep.subr.bf16.mxu1 %v2462_v4  ;;  %v2490_v1 = vld [vmem:[%s3338_s2 + $0x228] ss:$16 sps:$4 sm:$0xff]   ;;  %v2495_v3 = vld [vmem:[%s3338_s2 + $0x4c] ss:$16 sps:$4 sm:$0xff]  }
  0x76   : > { %v2498_v4 = vld [vmem:[%s3338_s2 + $0x24c] ss:$16 sps:$4 sm:$0xff]  }
  0x78   : > { %1715 = vmatpush1.bf16.msra.mxu0 %v2457_v5  ;;  %1756 = vmatpush1.bf16.msra.mxu1 %v2460_v6  ;;  %v2493_v5 = vld [vmem:[%s3338_s2 + $0x48] ss:$16 sps:$4 sm:$0xff]  }
  0x79   : > { %1716 = vmatprep.subr.bf16.mxu0 %v2465_v7  ;;  %1757 = vmatprep.subr.bf16.mxu1 %v2468_v2  ;;  %v2496_v6 = vld [vmem:[%s3338_s2 + $0x248] ss:$16 sps:$4 sm:$0xff]   ;;  %v2501_v7 = vld [vmem:[%s3338_s2 + $0x6c] ss:$16 sps:$4 sm:$0xff]  }
  0x7a   : > { %v2504_v2 = vld [vmem:[%s3338_s2 + $0x26c] ss:$16 sps:$4 sm:$0xff]  }
  0x7c   : > { %1717 = vmatpush1.bf16.msra.mxu0 %v2463_v8  ;;  %1758 = vmatpush1.bf16.msra.mxu1 %v2466_v9  ;;  %v2499_v8 = vld [vmem:[%s3338_s2 + $0x68] ss:$16 sps:$4 sm:$0xff]  }
  0x7d   : > { %1718 = vmatprep.subr.bf16.mxu0 %v2471_v10  ;;  %1759 = vmatprep.subr.bf16.mxu1 %v2474_v13  ;;  %v2502_v9 = vld [vmem:[%s3338_s2 + $0x268] ss:$16 sps:$4 sm:$0xff]   ;;  %v2507_v10 = vld [vmem:[%s3338_s2 + $0x8c] ss:$16 sps:$4 sm:$0xff]  }
  0x7e   : > { %v2508_v13 = vld [vmem:[%s3338_s2 + $0x288] ss:$16 sps:$4 sm:$0xff]  }
  0x80   : > { %1719 = vmatpush1.bf16.msra.mxu0 %v2469_v11  ;;  %1760 = vmatpush1.bf16.msra.mxu1 %v2472_v12  ;;  %v2510_v11 = vld [vmem:[%s3338_s2 + $0x28c] ss:$16 sps:$4 sm:$0xff]   ;;  %v2505_v12 = vld [vmem:[%s3338_s2 + $0x88] ss:$16 sps:$4 sm:$0xff]  }
  0x81   : > { %1720 = vmatprep.subr.bf16.mxu0 %v2477_v14  ;;  %1761 = vmatprep.subr.bf16.mxu1 %v2480_v15  ;;  %v2513_v14 = vld [vmem:[%s3338_s2 + $0xac] ss:$16 sps:$4 sm:$0xff]  }
  0x82   : > { %v2516_v15 = vld [vmem:[%s3338_s2 + $0x2ac] ss:$16 sps:$4 sm:$0xff]  }
  0x84   : > { %1721 = vmatpush1.bf16.msra.mxu0 %v2475_v16  ;;  %1762 = vmatpush1.bf16.msra.mxu1 %v2478_v17  ;;  %v2511_v16 = vld [vmem:[%s3338_s2 + $0xa8] ss:$16 sps:$4 sm:$0xff]  }
  0x85   : > { %1772 = vmatprep.subr.bf16.mxu0 %v2483_v18  ;;  %1813 = vmatprep.subr.bf16.mxu1 %v2486_v19  ;;  %v2514_v17 = vld [vmem:[%s3338_s2 + $0x2a8] ss:$16 sps:$4 sm:$0xff]   ;;  %v2519_v18 = vld [vmem:[%s3338_s2 + $0xcc] ss:$16 sps:$4 sm:$0xff]  }
  0x86   : > { %v2522_v19 = vld [vmem:[%s3338_s2 + $0x2cc] ss:$16 sps:$4 sm:$0xff]  }
 0x11a   : > { %v3096_v34 = vpop.f32.mrb[0].mxu0  ;;  %v3098_v35 = vpop.f32.mrb[0].mxu1 }
 0x11b   : > { %v885_v38 = vmul.f32 %v868_v28, %v3096_v34  ;;  %v887_v39 = vmul.f32 %v876_v29, %v3098_v35  ;;  %v3104_v40 = vpop.f32.mrb[1].mxu0  ;;  %v3106_v41 = vpop.f32.mrb[1].mxu1  ;;  %v2523_v28 = vld [vmem:[%s3338_s2 + $0xe8] ss:$16 sps:$4 sm:$0xff]  }
 0x11c   : > { %v886_v42 = vmul.f32 %v872_v30, %v3104_v40  ;;  %v888_v43 = vmul.f32 %v880_v31, %v3106_v41  ;;  %v811_v44 = vpop.f32.mrb[2].mxu0  ;;  %v852_v45 = vpop.f32.mrb[2].mxu1  ;;  %v2526_v29 = vld [vmem:[%s3338_s2 + $0x2e8] ss:$16 sps:$4 sm:$0xff]   ;;  %v2531_v30 = vld [vmem:[%s3338_s2 + $0x10c] ss:$16 sps:$4 sm:$0xff]  }
 0x11d   : > { %v910_v46 = vadd.f32 %v893_v32, %v885_v38  ;;  %v912_v47 = vadd.f32 %v901_v33, %v887_v39  ;;  %v812_v48 = vpop.f32.mrb[3].mxu0  ;;  %v853_v49 = vpop.f32.mrb[3].mxu1  ;;  %v2534_v31 = vld [vmem:[%s3338_s2 + $0x30c] ss:$16 sps:$4 sm:$0xff]   ;;  %v2529_v32 = vld [vmem:[%s3338_s2 + $0x108] ss:$16 sps:$4 sm:$0xff]  }
 0x11e   : > { %v911_v50 = vadd.f32 %v897_v36, %v886_v42  ;;  %v913_v51 = vadd.f32 %v905_v37, %v888_v43  ;;  %v2532_v33 = vld [vmem:[%s3338_s2 + $0x308] ss:$16 sps:$4 sm:$0xff]   ;;  %v2537_v36 = vld [vmem:[%s3338_s2 + $0x12c] ss:$16 sps:$4 sm:$0xff]  }
 0x11f   : > { %v914_v52 = vmax.f32 %v910_v46, 0.0  ;;  %v916_v53 = vmax.f32 %v912_v47, 0.0  ;;  %v2540_v37 = vld [vmem:[%s3338_s2 + $0x32c] ss:$16 sps:$4 sm:$0xff]   ;;  %v2535_v38 = vld [vmem:[%s3338_s2 + $0x128] ss:$16 sps:$4 sm:$0xff]  }
 0x120   : > { %v915_v54 = vmax.f32 %v911_v50, 0.0  ;;  %v917_v55 = vmax.f32 %v913_v51, 0.0  ;;  %v2538_v39 = vld [vmem:[%s3338_s2 + $0x328] ss:$16 sps:$4 sm:$0xff]   ;;  %v2543_v42 = vld [vmem:[%s3338_s2 + $0x14c] ss:$16 sps:$4 sm:$0xff]  }
 0x121   : > { %v3116_v60 = vpack.c.bf16 %v914_v52, %v914_v52  ;;  %v3118_v61 = vpack.c.bf16 %v916_v53, %v916_v53  ;;  %v2546_v43 = vld [vmem:[%s3338_s2 + $0x34c] ss:$16 sps:$4 sm:$0xff]   ;;  %v2541_v44 = vld [vmem:[%s3338_s2 + $0x148] ss:$16 sps:$4 sm:$0xff]  }
 0x122   : > { %v919_v56 = vpack.c.bf16 %v915_v54, %v915_v54  ;;  %v921_v57 = vpack.c.bf16 %v917_v55, %v917_v55  ;;  %v2544_v45 = vld [vmem:[%s3338_s2 + $0x348] ss:$16 sps:$4 sm:$0xff]   ;;  %v2549_v46 = vld [vmem:[%s3338_s2 + $0x16c] ss:$16 sps:$4 sm:$0xff]  }
 0x123   : > { %v2552_v47 = vld [vmem:[%s3338_s2 + $0x36c] ss:$16 sps:$4 sm:$0xff]   ;;  %v2547_v48 = vld [vmem:[%s3338_s2 + $0x168] ss:$16 sps:$4 sm:$0xff]  }
 0x124   : > { %1722 = vmatprep.mubr.bf16.mxu0 %v919_v56  ;;  %1763 = vmatprep.mubr.bf16.mxu1 %v921_v57  ;;  %v2550_v49 = vld [vmem:[%s3338_s2 + $0x368] ss:$16 sps:$4 sm:$0xff]   ;;  %v2555_v50 = vld [vmem:[%s3338_s2 + $0x18c] ss:$16 sps:$4 sm:$0xff]  }
 0x125   : > { %1723 = vmatmul.mubr.bf16.vlgmr.msra.gmra.mrb[4].mxu0 %v3116_v60  ;;  %1764 = vmatmul.mubr.bf16.vlgmr.msra.gmra.mrb[4].mxu1 %v3118_v61  ;;  %v2558_v51 = vld [vmem:[%s3338_s2 + $0x38c] ss:$16 sps:$4 sm:$0xff]   ;;  %v2553_v52 = vld [vmem:[%s3338_s2 + $0x188] ss:$16 sps:$4 sm:$0xff]  }
 0x126   : > { %1773 = vmatpush1.bf16.msra.mxu0 %v2481_v58  ;;  %1814 = vmatpush1.bf16.msra.mxu1 %v2484_v59  ;;  %v2556_v53 = vld [vmem:[%s3338_s2 + $0x388] ss:$16 sps:$4 sm:$0xff]   ;;  %v2561_v54 = vld [vmem:[%s3338_s2 + $0x1ac] ss:$16 sps:$4 sm:$0xff]  }
 0x127   : > { %1804 = vmatprep.mubr.bf16.mxu0 %v919_v56  ;;  %1845 = vmatprep.mubr.bf16.mxu1 %v921_v57  ;;  %v2564_v55 = vld [vmem:[%s3338_s2 + $0x3ac] ss:$16 sps:$4 sm:$0xff]   ;;  %v2559_v56 = vld [vmem:[%s3338_s2 + $0x1a8] ss:$16 sps:$4 sm:$0xff]  }
 0x128   : > { %1774 = vmatprep.subr.bf16.mxu0 %v2489_v62  ;;  %1815 = vmatprep.subr.bf16.mxu1 %v2492_v63  ;;  %v2562_v57 = vld [vmem:[%s3338_s2 + $0x3a8] ss:$16 sps:$4 sm:$0xff]   ;;  %v2567_v58 = vld [vmem:[%s3338_s2 + $0x1cc] ss:$16 sps:$4 sm:$0xff]  }
 0x129   : > { %v2570_v59 = vld [vmem:[%s3338_s2 + $0x3cc] ss:$16 sps:$4 sm:$0xff]   ;;  %v2565_v62 = vld [vmem:[%s3338_s2 + $0x1c8] ss:$16 sps:$4 sm:$0xff]  }
 0x12a   : > { %1775 = vmatpush1.bf16.msra.mxu0 %v2487_v0  ;;  %1816 = vmatpush1.bf16.msra.mxu1 %v2490_v1  ;;  %v2568_v63 = vld [vmem:[%s3338_s2 + $0x3c8] ss:$16 sps:$4 sm:$0xff]   ;;  %v2573_v0 = vld [vmem:[%s3338_s2 + $0x1ec] ss:$16 sps:$4 sm:$0xff]  }
 0x12b   : > { %1776 = vmatprep.subr.bf16.mxu0 %v2495_v3  ;;  %1817 = vmatprep.subr.bf16.mxu1 %v2498_v4  ;;  %v2576_v1 = vld [vmem:[%s3338_s2 + $0x3ec] ss:$16 sps:$4 sm:$0xff]   ;;  %v2571_v3 = vld [vmem:[%s3338_s2 + $0x1e8] ss:$16 sps:$4 sm:$0xff]  }
 0x12c   : > { %v2574_v4 = vld [vmem:[%s3338_s2 + $0x3e8] ss:$16 sps:$4 sm:$0xff]  }
 0x12e   : > { %1777 = vmatpush1.bf16.msra.mxu0 %v2493_v5  ;;  %1818 = vmatpush1.bf16.msra.mxu1 %v2496_v6  ;;  %v2108_v5 = vld [vmem:[%s3339_s3 + $0x2] ss:$8 sm:$0xf] }
 0x12f   : > { %1778 = vmatprep.subr.bf16.mxu0 %v2501_v7  ;;  %1819 = vmatprep.subr.bf16.mxu1 %v2504_v2 }
 0x132   : > { %1779 = vmatpush1.bf16.msra.mxu0 %v2499_v8  ;;  %1820 = vmatpush1.bf16.msra.mxu1 %v2502_v9  ;;  %v1858_v8 = vrot.slane %v2108_v5, %v3076_v22 }
 0x133   : > { %1780 = vmatprep.subr.bf16.mxu0 %v2507_v10  ;;  %1821 = vmatprep.subr.bf16.mxu1 %v2510_v11 }
 0x136   : > { %1781 = vmatpush1.bf16.msra.mxu0 %v2505_v12  ;;  %1822 = vmatpush1.bf16.msra.mxu1 %v2508_v13 }
 0x137   : > { %1782 = vmatprep.subr.bf16.mxu0 %v2513_v14  ;;  %1823 = vmatprep.subr.bf16.mxu1 %v2516_v15 }
 0x13a   : > { %1783 = vmatpush1.bf16.msra.mxu0 %v2511_v16  ;;  %1824 = vmatpush1.bf16.msra.mxu1 %v2514_v17 }
 0x13b   : > { %1784 = vmatprep.subr.bf16.mxu0 %v2519_v18  ;;  %1825 = vmatprep.subr.bf16.mxu1 %v2522_v19 }
 0x13e   : > { %1785 = vmatpush1.bf16.msra.mxu0 %v2517_v20  ;;  %1826 = vmatpush1.bf16.msra.mxu1 %v2520_v21  ;;  %v1866_v21 = vrot.slane %v2108_v5, %v3078_v23 }
 0x13f   : > { %1786 = vmatprep.subr.bf16.mxu0 %v2525_v24  ;;  %1827 = vmatprep.subr.bf16.mxu1 %v2528_v27 }
 0x142   : > { %1787 = vmatpush1.bf16.msra.mxu0 %v2523_v28  ;;  %1828 = vmatpush1.bf16.msra.mxu1 %v2526_v29  ;;  %v1870_v29 = vrot.slane %v2108_v5, %v3085_v26 }
 0x143   : > { %1788 = vmatprep.subr.bf16.mxu0 %v2531_v30  ;;  %1829 = vmatprep.subr.bf16.mxu1 %v2534_v31 }
 0x146   : > { %1789 = vmatpush1.bf16.msra.mxu0 %v2529_v32  ;;  %1830 = vmatpush1.bf16.msra.mxu1 %v2532_v33 }
 0x147   : > { %1790 = vmatprep.subr.bf16.mxu0 %v2537_v36  ;;  %1831 = vmatprep.subr.bf16.mxu1 %v2540_v37 }
 0x14a   : > { %1791 = vmatpush1.bf16.msra.mxu0 %v2535_v38  ;;  %1832 = vmatpush1.bf16.msra.mxu1 %v2538_v39 }
 0x14b   : > { %1792 = vmatprep.subr.bf16.mxu0 %v2543_v42  ;;  %1833 = vmatprep.subr.bf16.mxu1 %v2546_v43 }
 0x14e   : > { %1793 = vmatpush1.bf16.msra.mxu0 %v2541_v44  ;;  %1834 = vmatpush1.bf16.msra.mxu1 %v2544_v45 }
 0x14f   : > { %1794 = vmatprep.subr.bf16.mxu0 %v2549_v46  ;;  %1835 = vmatprep.subr.bf16.mxu1 %v2552_v47 }
 0x152   : > { %1795 = vmatpush1.bf16.msra.mxu0 %v2547_v48  ;;  %1836 = vmatpush1.bf16.msra.mxu1 %v2550_v49 }
 0x153   : > { %1796 = vmatprep.subr.bf16.mxu0 %v2555_v50  ;;  %1837 = vmatprep.subr.bf16.mxu1 %v2558_v51 }
 0x156   : > { %1797 = vmatpush1.bf16.msra.mxu0 %v2553_v52  ;;  %1838 = vmatpush1.bf16.msra.mxu1 %v2556_v53 }
 0x157   : > { %1798 = vmatprep.subr.bf16.mxu0 %v2561_v54  ;;  %1839 = vmatprep.subr.bf16.mxu1 %v2564_v55 }
 0x15a   : > { %1799 = vmatpush1.bf16.msra.mxu0 %v2559_v56  ;;  %1840 = vmatpush1.bf16.msra.mxu1 %v2562_v57 }
 0x15b   : > { %1800 = vmatprep.subr.bf16.mxu0 %v2567_v58  ;;  %1841 = vmatprep.subr.bf16.mxu1 %v2570_v59 }
 0x15e   : > { %1801 = vmatpush1.bf16.msra.mxu0 %v2565_v62  ;;  %1842 = vmatpush1.bf16.msra.mxu1 %v2568_v63 }
 0x15f   : > { %1802 = vmatprep.subr.bf16.mxu0 %v2573_v0  ;;  %1843 = vmatprep.subr.bf16.mxu1 %v2576_v1 }
 0x162   : > { %1803 = vmatpush1.bf16.msra.mxu0 %v2571_v3  ;;  %1844 = vmatpush1.bf16.msra.mxu1 %v2574_v4 }
 0x165   : > { %1805 = vmatmul.mubr.bf16.vlgmr.msra.gmra.mrb[8].mxu0 %v3116_v60  ;;  %1846 = vmatmul.mubr.bf16.vlgmr.msra.gmra.mrb[8].mxu1 %v3118_v61  ;;  %v1862_v61 = vrot.slane %v2108_v5, %v3083_v25 }
 0x1f8   : > { %v1724_v6 = vpop.f32.mrb[4].mxu0  ;;  %v1765_v7 = vpop.f32.mrb[4].mxu1 }
 0x1f9   : > { %v1725_v2 = vadd.f32 %v1724_v6, %v3096_v34  ;;  %v1726_v9 = vpop.f32.mrb[5].mxu0  ;;  %v1767_v10 = vpop.f32.mrb[5].mxu1 }
 0x1fa   : > { %v1727_v60 = vadd.f32 %v1726_v9, %v3104_v40  ;;  %v1728_v11 = vpop.f32.mrb[6].mxu0  ;;  %v1769_v12 = vpop.f32.mrb[6].mxu1 }
 0x1fb   : > { %v1766_v13 = vadd.f32 %v1765_v7, %v1725_v2  ;;  %v1729_v14 = vpop.f32.mrb[7].mxu0  ;;  %v1770_v15 = vpop.f32.mrb[7].mxu1 }
 0x1fc   : > { %v1768_v16 = vadd.f32 %v1767_v10, %v1727_v60 }
 0x1fd   : > { %v1875_v17 = vadd.f32 %v1858_v8, %v1766_v13 }
 0x1fe   : > { %v1876_v18 = vadd.f32 %v1862_v61, %v1768_v16 }
 0x1ff   : > { %v1879_v19 = vmax.f32 %v1875_v17, 0.0 }
 0x200   : > { %v1880_v34 = vmax.f32 %v1876_v18, 0.0 }
 0x202   : > { %v2241_v22 = vpack.c.bf16 %v1880_v34, %v1879_v19 }
 0x204   : > { %1899 = vst [vmem:[%s219_s23] sm:$0xff] %v2241_v22 }
 0x238   : > { %v1806_v40 = vpop.f32.mrb[8].mxu0  ;;  %v1847_v25 = vpop.f32.mrb[8].mxu1 }
 0x239   : > { %v1807_v20 = vadd.f32 %v1806_v40, %v3098_v35  ;;  %v1808_v24 = vpop.f32.mrb[9].mxu0  ;;  %v1849_v27 = vpop.f32.mrb[9].mxu1 }
 0x23a   : > { %v1809_v28 = vadd.f32 %v1808_v24, %v3106_v41  ;;  %v1810_v30 = vpop.f32.mrb[10].mxu0  ;;  %v1851_v31 = vpop.f32.mrb[10].mxu1 }
 0x23b   : > { %v1848_v32 = vadd.f32 %v1847_v25, %v1807_v20  ;;  %v1811_v33 = vpop.f32.mrb[11].mxu0  ;;  %v1852_v36 = vpop.f32.mrb[11].mxu1 }
 0x23c   : > { %v1850_v37 = vadd.f32 %v1849_v27, %v1809_v28 }
 0x23d   : > { %v1877_v38 = vadd.f32 %v1866_v21, %v1848_v32 }
 0x23e   : > { %v1878_v39 = vadd.f32 %v1870_v29, %v1850_v37 }
 0x23f   : > { %v1881_v42 = vmax.f32 %v1877_v38, 0.0 }
 0x240   : > { %v1882_v43 = vmax.f32 %v1878_v39, 0.0 }
 0x242   : > { %v2242_v44 = vpack.c.bf16 %v1882_v43, %v1881_v42 }
 0x244   : > { %1900 = vst [vmem:[%s219_s23 + $0x8] sm:$0xff] %v2242_v44 }
 0x245 PF: > { %s14_s19 = sadd.s32 1, %s2615_s19   ;;  %s3341_s15 = smov %s2607_s17 }
 0x246   : > { %p11_p7 = scmp.ge.s32.totalorder %s14_s19, 6   ;;  %s3342_s16 = smov %s2611_s18 }
 0x247   : > { %s3343_s17 = smov %s3346_s20  ;;  %s3344_s18 = smov %s3350_s21 }
 0x248   :  { %13 = sbr.rel (!%p11_p7) target bundleno = 3 (0x3), region = 71 }

</bundles_post_ra>
